<compile_context>
chip_gen: v7x
topology: tpu7x:2x2x1
jax: 0.10.0
libtpu: 0.0.40
codegen_flags: <defaults>
</compile_context>

<pallas_src>
import functools

import jax
import jax.numpy as jnp
from jax.experimental import pallas as pl
from jax.experimental.pallas import tpu as pltpu

_SUBLANE = 8    # batch tile must be a multiple of the f32 sublane width


def _mlp_kernel(x_ref, w1_ref, b1_ref, w2_ref, b2_ref, w3_ref, b3_ref, o_ref):
    cdt = w1_ref.dtype  # operand (MXU input) dtype: bf16 by default, f32 optional
    # Linear 1 + ReLU  (MXU, f32 accumulate; bias add + ReLU in f32 on the VPU)
    h1 = jnp.dot(x_ref[...], w1_ref[...], preferred_element_type=jnp.float32)
    h1 = jnp.maximum(h1 + b1_ref[...], 0.0)
    # Linear 2 (hidden -> 6) + ReLU
    h2 = jnp.dot(h1.astype(cdt), w2_ref[...], preferred_element_type=jnp.float32)
    h2 = jnp.maximum(h2 + b2_ref[...], 0.0)
    # Linear 3 (6 -> output)
    out = jnp.dot(h2.astype(cdt), w3_ref[...], preferred_element_type=jnp.float32)
    o_ref[...] = (out + b3_ref[...]).astype(o_ref.dtype)


def _round_up(n, m):
    return ((n + m - 1) // m) * m


def botnn_forward(x, params, *, block_batch=2048, compute_dtype=jnp.bfloat16):
    """x: [B, input_size]; params: dict of transposed weights / (1, n) biases."""
    w1, b1, w2, b2, w3, b3 = (params["w1"], params["b1"], params["w2"],
                              params["b2"], params["w3"], params["b3"])
    B, in_size = x.shape
    hidden = w1.shape[1]
    mid = w2.shape[1]          # == 6 in the reference module
    out_size = w3.shape[1]

    # ---- batch tiling ----
    # Cap the tile so the batch grid has >= 2 blocks whenever B allows it
    # (keeps both v7x TensorCores busy via the "parallel" axis); large default
    # tile amortizes per-step overhead. Only the batch dim is ever padded.
    tb = min(block_batch, _round_up(pl.cdiv(B, 2), _SUBLANE))
    b_p = _round_up(B, tb)
    grid = (b_p // tb,)

    # ---- operand casts (bf16 by default; accumulation stays f32 in-kernel) ----
    x_c = x.astype(compute_dtype)
    if b_p != B:
        x_c = jnp.pad(x_c, ((0, b_p - B), (0, 0)))
    w1_c, w2_c, w3_c = (w.astype(compute_dtype) for w in (w1, w2, w3))
    b1_f, b2_f, b3_f = (b.astype(jnp.float32) for b in (b1, b2, b3))

    def resident(shape):
        # Constant block index -> stays in VMEM across all grid iterations.
        return pl.BlockSpec(shape, lambda i: (0, 0))

    flops = 2 * B * (in_size * hidden + hidden * mid + mid * out_size)
    bytes_accessed = (
        x_c.size * x_c.dtype.itemsize
        + sum(a.size * a.dtype.itemsize
              for a in (w1_c, b1_f, w2_c, b2_f, w3_c, b3_f))
        + b_p * out_size * 4)

    out = pl.pallas_call(
        _mlp_kernel,
        out_shape=jax.ShapeDtypeStruct((b_p, out_size), jnp.float32),
        grid=grid,
        in_specs=[
            # activations stream in, tb rows per step (full-dim lane axis: no pad)
            pl.BlockSpec((tb, in_size), lambda i: (i, 0)),
            resident((in_size, hidden)), resident((1, hidden)),
            resident((hidden, mid)),     resident((1, mid)),
            resident((mid, out_size)),   resident((1, out_size)),
        ],
        # full-dim last axis: output written unpadded (16 B/row instead of 512 B/row)
        out_specs=pl.BlockSpec((tb, out_size), lambda i: (i, 0)),
        compiler_params=pltpu.CompilerParams(
            dimension_semantics=("parallel",)),   # shards batch across v7x's 2 TCs
        cost_estimate=pl.CostEstimate(
            flops=flops, transcendentals=0, bytes_accessed=bytes_accessed),
    )(x_c, w1_c, b1_f, w2_c, b2_f, w3_c, b3_f)

    return out[:B] if b_p != B else out


def init_params(key, input_size, hidden_size, output_size):
    """Deterministic init mimicking nn.Linear's uniform(-1/sqrt(fan_in), 1/sqrt(fan_in))."""
    ks = jax.random.split(key, 6)

    def linear(kw, kb, fan_in, fan_out):
        bound = 1.0 / jnp.sqrt(fan_in)
        # stored as [fan_in, fan_out] (transpose of PyTorch layout)
        w = jax.random.uniform(kw, (fan_in, fan_out), jnp.float32, -bound, bound)
        b = jax.random.uniform(kb, (1, fan_out), jnp.float32, -bound, bound)
        return w, b

    w1, b1 = linear(ks[0], ks[1], input_size, hidden_size)
    w2, b2 = linear(ks[2], ks[3], hidden_size, 6)
    w3, b3 = linear(ks[4], ks[5], 6, output_size)
    return {"w1": w1, "b1": b1, "w2": w2, "b2": b2, "w3": w3, "b3": b3}


def reference_forward(x, p):
    h1 = jnp.maximum(x @ p["w1"] + p["b1"], 0.0)
    h2 = jnp.maximum(h1 @ p["w2"] + p["b2"], 0.0)
    return h2 @ p["w3"] + p["b3"]


if __name__ == "__main__":
    batch, input_size, hidden_size, output_size = 8, 32, 16, 4

    key = jax.random.PRNGKey(0)
    kx, kp = jax.random.split(key)
    x = jax.random.normal(kx, (batch, input_size), jnp.float32)
    params = init_params(kp, input_size, hidden_size, output_size)

    ref = reference_forward(x, params)

    # Exact-parity path: f32 operands, tight tolerance.
    fwd_f32 = jax.jit(functools.partial(botnn_forward, compute_dtype=jnp.float32))
    out_f32 = jax.block_until_ready(fwd_f32(x, params))
    assert out_f32.shape == (batch, output_size)
    assert jnp.allclose(out_f32, ref, atol=1e-5, rtol=1e-5)

    # Default production path: bf16 operands / f32 accumulate, looser tolerance.
    fwd = jax.jit(botnn_forward)
    out = jax.block_until_ready(fwd(x, params))
    assert out.shape == (batch, output_size)
    assert jnp.allclose(out, ref, atol=3e-2, rtol=3e-2)

    print("KERNEL_OK")
</pallas_src>

<mosaic_0001>
module attributes {stable_mosaic.version = 11 : i64} {
  func.func @_mlp_kernel(%arg0: i32, %arg1: memref<8x32xf32, #tpu.memory_space<vmem>>, %arg2: memref<32x16xf32, #tpu.memory_space<vmem>>, %arg3: memref<1x16xf32, #tpu.memory_space<vmem>>, %arg4: memref<16x6xf32, #tpu.memory_space<vmem>>, %arg5: memref<1x6xf32, #tpu.memory_space<vmem>>, %arg6: memref<6x4xf32, #tpu.memory_space<vmem>>, %arg7: memref<1x4xf32, #tpu.memory_space<vmem>>, %arg8: memref<8x4xf32, #tpu.memory_space<vmem>>) attributes {dimension_semantics = [#tpu.dimension_semantics<parallel>], iteration_bounds = array<i64: 1>, scalar_prefetch = 0 : i64, scratch_operands = 0 : i64, tpu.core_type = #tpu.core_type<tc>, window_params = [{transform_indices = @transform_0, window_bounds = array<i64: 8, 32>}, {pipeline_mode = #tpu.pipeline_mode<synchronous>, transform_indices = @transform_1, window_bounds = array<i64: 32, 16>}, {pipeline_mode = #tpu.pipeline_mode<synchronous>, transform_indices = @transform_2, window_bounds = array<i64: 1, 16>}, {pipeline_mode = #tpu.pipeline_mode<synchronous>, transform_indices = @transform_3, window_bounds = array<i64: 16, 6>}, {pipeline_mode = #tpu.pipeline_mode<synchronous>, transform_indices = @transform_4, window_bounds = array<i64: 1, 6>}, {pipeline_mode = #tpu.pipeline_mode<synchronous>, transform_indices = @transform_5, window_bounds = array<i64: 6, 4>}, {pipeline_mode = #tpu.pipeline_mode<synchronous>, transform_indices = @transform_6, window_bounds = array<i64: 1, 4>}, {transform_indices = @transform_7, window_bounds = array<i64: 8, 4>}]} {
    %c0 = arith.constant 0 : index
    %c0_0 = arith.constant 0 : index
    %0 = vector.load %arg1[%c0, %c0_0] : memref<8x32xf32, #tpu.memory_space<vmem>>, vector<8x32xf32>
    %c0_1 = arith.constant 0 : index
    %c0_2 = arith.constant 0 : index
    %1 = vector.load %arg2[%c0_1, %c0_2] : memref<32x16xf32, #tpu.memory_space<vmem>>, vector<32x16xf32>
    %cst = arith.constant dense<0.000000e+00> : vector<8x16xf32>
    %2 = tpu.matmul %0, %1, %cst {dimension_numbers = #tpu.dot_dimension_numbers<[1], [0], [0], [1], [0, 0, 1, 1], [], []>} : vector<8x32xf32>, vector<32x16xf32>, vector<8x16xf32> -> vector<8x16xf32>
    %c0_3 = arith.constant 0 : index
    %c0_4 = arith.constant 0 : index
    %3 = vector.load %arg3[%c0_3, %c0_4] : memref<1x16xf32, #tpu.memory_space<vmem>>, vector<1x16xf32>
    %4 = vector.broadcast %3 : vector<1x16xf32> to vector<8x16xf32>
    %5 = arith.addf %2, %4 : vector<8x16xf32>
    %cst_5 = arith.constant 0.000000e+00 : f32
    %6 = vector.broadcast %cst_5 : f32 to vector<8x16xf32>
    %7 = arith.maximumf %5, %6 : vector<8x16xf32>
    %c0_6 = arith.constant 0 : index
    %c0_7 = arith.constant 0 : index
    %8 = vector.load %arg4[%c0_6, %c0_7] : memref<16x6xf32, #tpu.memory_space<vmem>>, vector<16x6xf32>
    %cst_8 = arith.constant dense<0.000000e+00> : vector<8x6xf32>
    %9 = tpu.matmul %7, %8, %cst_8 {dimension_numbers = #tpu.dot_dimension_numbers<[1], [0], [0], [1], [0, 0, 1, 1], [], []>} : vector<8x16xf32>, vector<16x6xf32>, vector<8x6xf32> -> vector<8x6xf32>
    %c0_9 = arith.constant 0 : index
    %c0_10 = arith.constant 0 : index
    %10 = vector.load %arg5[%c0_9, %c0_10] : memref<1x6xf32, #tpu.memory_space<vmem>>, vector<1x6xf32>
    %11 = vector.broadcast %10 : vector<1x6xf32> to vector<8x6xf32>
    %12 = arith.addf %9, %11 : vector<8x6xf32>
    %cst_11 = arith.constant 0.000000e+00 : f32
    %13 = vector.broadcast %cst_11 : f32 to vector<8x6xf32>
    %14 = arith.maximumf %12, %13 : vector<8x6xf32>
    %c0_12 = arith.constant 0 : index
    %c0_13 = arith.constant 0 : index
    %15 = vector.load %arg6[%c0_12, %c0_13] : memref<6x4xf32, #tpu.memory_space<vmem>>, vector<6x4xf32>
    %cst_14 = arith.constant dense<0.000000e+00> : vector<8x4xf32>
    %16 = tpu.matmul %14, %15, %cst_14 {dimension_numbers = #tpu.dot_dimension_numbers<[1], [0], [0], [1], [0, 0, 1, 1], [], []>} : vector<8x6xf32>, vector<6x4xf32>, vector<8x4xf32> -> vector<8x4xf32>
    %c0_15 = arith.constant 0 : index
    %c0_16 = arith.constant 0 : index
    %17 = vector.load %arg7[%c0_15, %c0_16] : memref<1x4xf32, #tpu.memory_space<vmem>>, vector<1x4xf32>
    %18 = vector.broadcast %17 : vector<1x4xf32> to vector<8x4xf32>
    %19 = arith.addf %16, %18 : vector<8x4xf32>
    %c0_17 = arith.constant 0 : index
    %c0_18 = arith.constant 0 : index
    %20 = vector.load %arg8[%c0_17, %c0_18] : memref<8x4xf32, #tpu.memory_space<vmem>>, vector<8x4xf32>
    tpu.vector_store %arg8[%c0_17, %c0_18], %19 {strides = array<i32>} : memref<8x4xf32, #tpu.memory_space<vmem>>, vector<8x4xf32>,
    return
  }
  func.func @transform_0(%arg0: i32) -> (i32, i32) {
    %c0_i32 = arith.constant 0 : i32
    %c0_i32_0 = arith.constant 0 : i32
    return %arg0, %c0_i32 : i32, i32
  }
  func.func @transform_1(%arg0: i32) -> (i32, i32) {
    %c0_i32 = arith.constant 0 : i32
    %c0_i32_0 = arith.constant 0 : i32
    %c0_i32_1 = arith.constant 0 : i32
    return %c0_i32, %c0_i32_0 : i32, i32
  }
  func.func @transform_2(%arg0: i32) -> (i32, i32) {
    %c0_i32 = arith.constant 0 : i32
    %c0_i32_0 = arith.constant 0 : i32
    %c0_i32_1 = arith.constant 0 : i32
    return %c0_i32, %c0_i32_0 : i32, i32
  }
  func.func @transform_3(%arg0: i32) -> (i32, i32) {
    %c0_i32 = arith.constant 0 : i32
    %c0_i32_0 = arith.constant 0 : i32
    %c0_i32_1 = arith.constant 0 : i32
    return %c0_i32, %c0_i32_0 : i32, i32
  }
  func.func @transform_4(%arg0: i32) -> (i32, i32) {
    %c0_i32 = arith.constant 0 : i32
    %c0_i32_0 = arith.constant 0 : i32
    %c0_i32_1 = arith.constant 0 : i32
    return %c0_i32, %c0_i32_0 : i32, i32
  }
  func.func @transform_5(%arg0: i32) -> (i32, i32) {
    %c0_i32 = arith.constant 0 : i32
    %c0_i32_0 = arith.constant 0 : i32
    %c0_i32_1 = arith.constant 0 : i32
    return %c0_i32, %c0_i32_0 : i32, i32
  }
  func.func @transform_6(%arg0: i32) -> (i32, i32) {
    %c0_i32 = arith.constant 0 : i32
    %c0_i32_0 = arith.constant 0 : i32
    %c0_i32_1 = arith.constant 0 : i32
    return %c0_i32, %c0_i32_0 : i32, i32
  }
  func.func @transform_7(%arg0: i32) -> (i32, i32) {
    %c0_i32 = arith.constant 0 : i32
    %c0_i32_0 = arith.constant 0 : i32
    return %arg0, %c0_i32 : i32, i32
  }
}

</mosaic_0001>

<bundles_post_ra>
// kernel: botnn_forward.1
= control target key start
LH: loop header
LB: loop body
LE: loop exit
PB: predicated region body
PF: predicated region fallthrough
CT: control target
= control target key end

     0   :  { %v341_v0 = vmov 0.0|0.0   ;;  %vm342_vm0 = vmmov 0   ;;  %v343_v4 = vmov 0.0   ;;  %vm38_vm1 = vcmask 261120   ;;  %s423_s1 = inlined_call_operand.vmem [shape: f32[32,16], index: 1, kind: input, shape index: {}]   ;;  %s424_s0 = inlined_call_operand.vmem [shape: f32[8,32], index: 0, kind: input, shape index: {}]   ;;  %s425_s3 = inlined_call_operand.vmem [shape: f32[16,6], index: 3, kind: input, shape index: {}]   ;;  %s426_s2 = inlined_call_operand.vmem [shape: f32[1,16], index: 2, kind: input, shape index: {}]   ;;  %s427_s5 = inlined_call_operand.vmem [shape: f32[6,4], index: 5, kind: input, shape index: {}]   ;;  %s428_s4 = inlined_call_operand.vmem [shape: f32[1,6], index: 4, kind: input, shape index: {}]   ;;  %s429_s6 = inlined_call_operand.vmem [shape: f32[1,4], index: 6, kind: input, shape index: {}]   ;;  %s430_s7 = inlined_call_operand.vmem [shape: f32[8,4], index: 7, kind: output, shape index: {}]  }
   0x1   :  { %329 = vmatprep.subr.bf16.mxu0 %v341_v0  ;;  %v27_v1 = vld [vmem:[%s423_s1] sm:$0xff]  ;;  %v28_v2 = vld [vmem:[%s423_s1 + $0x8] sm:$0xff]  ;;  %v29_v3 = vld [vmem:[%s423_s1 + $0x10] sm:$0xff]  ;;  %314 = vmatprep.mubr.msk.f32.mxu0 %vm342_vm0, %v343_v4  ;;  %vm122_vm2 = vcmask 130048   ;;  %vm209_vm3 = vcmask 1045504   ;;  %vm205_vm4 = vcmask 48128  }
   0x2   :  { %v330_v5 = vpack.c.bf16 %v28_v2, %v27_v1  ;;  %v30_v6 = vld [vmem:[%s423_s1 + $0x18] sm:$0xff]  ;;  %335 = vmatprep.subr.bf16.mxu1 %v341_v0  ;;  %321 = vmatprep.mubr.msk.f32.mxu1 %vm342_vm0, %v343_v4  ;;  %v26_v8 = vld [vmem:[%s424_s0] sm:$0xff]  ;;  %v114_v10 = vld [vmem:[%s425_s3 + $0x8] sm:$0xff]  ;;  %vm283_vm5 = vcmask 31744  }
   0x3   :  { %v333_v7 = vpack.c.bf16 %v30_v6, %v29_v3  ;;  %v113_v9 = vld [vmem:[%s425_s3] sm:$0xff] }
   0x4   :  { %331 = vmatpush3.bf16.msra.mxu0 %v330_v5  ;;  %v336_v11 = vpack.c.bf16 %v114_v10, %v113_v9  ;;  %v289_v12 = vld [vmem:[%s426_s2] ss:$0 sm:$0xff] }
   0x5   :  { %332 = vmatprep.subr.bf16.mxu0 %v341_v0  ;;  %v197_v17 = vld [vmem:[%s427_s5] sm:$0x3f] }
   0x6   :  { %337 = vmatpush3.bf16.msra.mxu1 %v336_v11  ;;  %v291_v18 = vld [vmem:[%s428_s4] ss:$0 sm:$0xff] }
   0x7   :  { %324 = vmatprep.subr.mxu1 %v343_v4  ;;  %v293_v23 = vld [vmem:[%s429_s6] ss:$0 sm:$0xff] }
   0x8   :  { %334 = vmatpush3.bf16.msra.mxu0 %v333_v7 }
   0xb   :  { %315 = vmatmul.mubr.msk.f32.vlgmr.msra.gmra.mrb[0].mxu0 %vm38_vm1, %v26_v8 }
  0xde   :  { %v108_v13 = vpop.f32.mrb[0].mxu0 }
  0xdf   :  { %v109_v14 = vadd.f32 %v289_v12, %v108_v13  ;;  %v316_v15 = vpop.f32.mrb[1].mxu0 }
  0xe1   :  { %v112_v16 = vmax.f32 %v109_v14, 0.0 }
  0xe3   :  { %322 = vmatmul.mubr.msk.f32.vlgmr.msra.gmra.mrb[0].mxu1 %vm122_vm2, %v112_v16 }
  0xe4   :  { %326 = vmatprep.mubr.msk.f32.mxu1 %vm342_vm0, %v343_v4  ;;  %325 = vmatpush3.msk.msra.mxu1 %vm209_vm3, %v197_v17 }
 0x1b6   :  { %v192_v19 = vpop.f32.mrb[0].mxu1 }
 0x1b7   :  { %v193_v20 = vadd.f32 %v291_v18, %v192_v19  ;;  %v323_v21 = vpop.f32.mrb[1].mxu1 }
 0x1b9   :  { %v196_v22 = vmax.f32 %v193_v20, 0.0 }
 0x1bb   :  { %327 = vmatmul.mubr.msk.f32.vlgmr.msra.gmra.mrb[2].mxu1 %vm205_vm4, %v196_v22 }
 0x28e   :  { %v279_v24 = vpop.f32.mrb[2].mxu1 }
 0x28f   :  { %v280_v25 = vadd.f32 %v293_v23, %v279_v24  ;;  %v328_v26 = vpop.f32.mrb[3].mxu1 }
 0x291   :  { %284 = vst.msk [vmem:[%s430_s7] sm:$0xff] %vm283_vm5, %v280_v25 }

</bundles_post_ra>
